<compile_context>
chip_gen: v7x
topology: tpu7x:2x2x1
jax: 0.10.0
libtpu: 0.0.40
codegen_flags: <defaults>
</compile_context>

<pallas_src>
import functools

import jax
import jax.numpy as jnp
from jax import lax
from jax.experimental import pallas as pl
from jax.experimental.pallas import tpu as pltpu


def _focal_loss_kernel(logits_ref, target_ref, loss_ref, *, gamma: float, batch: int):
    # One batch tile: logits [TB, C] (native dtype), targets [TB, 1] int32,
    # output [1, 1, TB] f32 (lane-dense row of per-sample losses).
    x = logits_ref[...]
    if x.dtype != jnp.bfloat16:
        x = x.astype(jnp.float32)          # f32 heavy pass for f32 inputs
    tb, c = x.shape
    tgt = target_ref[...]                  # [TB, 1] int32

    # Single fused pass over the [TB, C] tile: shifted logits feed both the
    # log-sum-exp and the target gather.  Row sums accumulate in f32.
    row_max = jnp.max(x, axis=-1, keepdims=True)                     # [TB, 1]
    shifted = x - row_max                                            # [TB, C]
    e = jnp.exp(shifted)                                             # [TB, C] (EUP)
    sumexp = jnp.sum(e, axis=-1, keepdims=True, dtype=jnp.float32)   # [TB, 1] f32

    col_ids = lax.broadcasted_iota(jnp.int32, (tb, c), 1)            # [TB, C]
    tgt_shifted = jnp.sum(jnp.where(col_ids == tgt, shifted, 0),
                          axis=-1, keepdims=True, dtype=jnp.float32)  # [TB, 1] f32

    # Per-sample cross entropy; clamp >= 0 so pt <= 1 and the focal base stays
    # in [0, 1] (avoids NaN for fractional gamma).
    ce = jnp.maximum(jnp.log(sumexp) - tgt_shifted, 0.0)             # [TB, 1] f32
    pt = jnp.exp(-ce)
    base = 1.0 - pt                                                  # in [0, 1]

    g = float(gamma)
    if g == 0.0:
        focal = jnp.ones_like(base)
    elif g.is_integer() and 0.0 < g <= 8.0:
        # Integer gamma: multiply chain on the VPU (no transcendentals).
        focal = base
        for _ in range(int(g) - 1):
            focal = focal * base
    else:
        # Fractional gamma: pow(base, g) via exp/log; base already >= 0.
        safe = jnp.maximum(base, jnp.float32(1e-30))
        focal = jnp.where(base > 0.0,
                          jnp.exp(jnp.float32(g) * jnp.log(safe)),
                          jnp.float32(0.0))

    # Lane-dense store: transpose the [TB,1] column to a [1,TB] row (one XLU
    # transpose) and zero any rows beyond the true batch (partial last tile).
    loss_row = jnp.transpose(focal * ce)                              # [1, TB]
    rows = pl.program_id(0) * tb + lax.broadcasted_iota(jnp.int32, (1, tb), 1)
    loss_row = jnp.where(rows < batch, loss_row, 0.0)
    loss_ref[...] = loss_row.reshape(1, 1, tb)


def _vmem_capacity_bytes() -> int:
    try:
        cap = int(pltpu.get_tpu_info().vmem_capacity_bytes)
        if cap > 0:
            return cap
    except Exception:
        pass
    return 64 * 1024 * 1024  # conservative fallback (v7x per-TC VMEM)


def _choose_tile_rows(batch: int, num_classes: int, in_itemsize: int,
                      compute_itemsize: int, budget_bytes: int) -> int:
    """Pick a batch-tile size from a generation-aware VMEM working-set budget.

    Per-row cost: double-buffered input stream + ~3 live [TB, C] compute-dtype
    temporaries + the int32 column-id iota + misc.  No artificial row cap; the
    only caps are the byte budget and 'at least 2 grid steps when possible'.
    """
    per_row = num_classes * (2 * in_itemsize + 3 * compute_itemsize + 4) + 128
    tb_budget = max(8, (budget_bytes // per_row) // 8 * 8)
    # >= 2 grid steps when the batch allows it (megacore sharding on v7x; one
    # extra ~0.35us step is noise on single-TC v5e/v6e).
    half = -(-batch // 2)
    half8 = -(-half // 8) * 8
    return min(tb_budget, max(8, half8))


def focal_loss(logits: jax.Array, target: jax.Array,
               gamma: float = 2.0, reduction: str = "mean") -> jax.Array:
    """Pallas focal loss. logits: [B, C] float (any float dtype); target: [B] int."""
    assert logits.ndim == 2 and target.ndim == 1
    B, C = logits.shape

    in_itemsize = jnp.dtype(logits.dtype).itemsize
    compute_itemsize = 2 if logits.dtype == jnp.bfloat16 else 4

    vmem_cap = _vmem_capacity_bytes()                       # 128 MiB v5e/v6e, 64 MiB v7x
    budget = min(48 * 1024 * 1024, int(vmem_cap * 0.55))    # tile working set
    vmem_limit = min(96 * 1024 * 1024, int(vmem_cap * 0.75))

    tb = _choose_tile_rows(B, C, in_itemsize, compute_itemsize, budget)
    num_tiles = -(-B // tb)
    b_pad = num_tiles * tb

    # Only the tiny target vector is padded; logits stream straight from HBM
    # with a partial (Pallas-masked) last block.
    target_i32 = target.astype(jnp.int32)
    if b_pad != B:
        target_i32 = jnp.pad(target_i32, (0, b_pad - B))
    target2d = target_i32.reshape(b_pad, 1)

    # 3-deep pipeline on the logits stream when steps are small and numerous.
    if num_tiles >= 3 and tb * C * in_itemsize < (1 << 20):
        logits_spec = pl.BlockSpec((tb, C), lambda i: (i, 0),
                                   pipeline_mode=pl.Buffered(3))
    else:
        logits_spec = pl.BlockSpec((tb, C), lambda i: (i, 0))

    per_row = pl.pallas_call(
        functools.partial(_focal_loss_kernel, gamma=gamma, batch=B),
        out_shape=jax.ShapeDtypeStruct((num_tiles, 1, tb), jnp.float32),
        grid_spec=pltpu.PrefetchScalarGridSpec(
            num_scalar_prefetch=0,
            grid=(num_tiles,),
            in_specs=[
                logits_spec,                                # logits tile [TB, C]
                pl.BlockSpec((tb, 1), lambda i: (i, 0)),    # target tile [TB, 1]
            ],
            out_specs=pl.BlockSpec((1, 1, tb), lambda i: (i, 0, 0)),  # lane-dense
        ),
        compiler_params=pltpu.CompilerParams(
            dimension_semantics=("parallel",),
            vmem_limit_bytes=vmem_limit,
        ),
    )(logits, target2d)

    loss = per_row.reshape(b_pad)[:B]                       # drop padded rows
    if reduction == "mean":
        return jnp.mean(loss)
    elif reduction == "sum":
        return jnp.sum(loss)
    elif reduction == "none":
        return loss
    else:
        raise ValueError(f"unknown reduction: {reduction!r}")


def _ref_focal_loss(logits, target, gamma=2.0, reduction="mean"):
    # Pure-JAX reference (mirrors F.cross_entropy + focal weighting).
    logp = jax.nn.log_softmax(logits.astype(jnp.float32), axis=-1)
    ce = -jnp.take_along_axis(logp, target[:, None].astype(jnp.int32), axis=-1)[:, 0]
    pt = jnp.exp(-ce)
    loss = (1.0 - pt) ** gamma * ce
    if reduction == "mean":
        return jnp.mean(loss)
    elif reduction == "sum":
        return jnp.sum(loss)
    return loss


if __name__ == "__main__":
    key = jax.random.PRNGKey(0)
    k1, k2, k3, k4, k5, k6 = jax.random.split(key, 6)

    # Small shapes consistent with the module: [B, C] logits, [B] class ids.
    B, C = 8, 32
    logits = jax.random.normal(k1, (B, C), dtype=jnp.float32)
    target = jax.random.randint(k2, (B,), 0, C, dtype=jnp.int32)

    # mean reduction, integer gamma (default path)
    out = jax.block_until_ready(focal_loss(logits, target, gamma=2.0, reduction="mean"))
    ref = _ref_focal_loss(logits, target, gamma=2.0, reduction="mean")
    assert jnp.allclose(out, ref, atol=1e-5, rtol=1e-5), (out, ref)

    # sum and none reductions
    out_sum = jax.block_until_ready(focal_loss(logits, target, 2.0, "sum"))
    ref_sum = _ref_focal_loss(logits, target, 2.0, "sum")
    assert jnp.allclose(out_sum, ref_sum, atol=1e-5, rtol=1e-5), (out_sum, ref_sum)

    out_none = jax.block_until_ready(focal_loss(logits, target, 2.0, "none"))
    ref_none = _ref_focal_loss(logits, target, 2.0, "none")
    assert jnp.allclose(out_none, ref_none, atol=1e-5, rtol=1e-5)

    # non-integer gamma (exp/log path) + batch not a multiple of the tile
    # (partial last block, no logits padding).
    B2 = 10
    logits2 = jax.random.normal(k3, (B2, C), dtype=jnp.float32)
    target2 = jax.random.randint(k4, (B2,), 0, C, dtype=jnp.int32)
    out2 = jax.block_until_ready(focal_loss(logits2, target2, gamma=1.5))
    ref2 = _ref_focal_loss(logits2, target2, gamma=1.5)
    assert jnp.allclose(out2, ref2, atol=1e-5, rtol=1e-5), (out2, ref2)

    # bf16 logits: heavy pass stays bf16 in-kernel (relaxed tolerance).
    B3, C3 = 64, 256
    logits3 = jax.random.normal(k5, (B3, C3), dtype=jnp.float32).astype(jnp.bfloat16)
    target3 = jax.random.randint(k6, (B3,), 0, C3, dtype=jnp.int32)
    out3 = jax.block_until_ready(focal_loss(logits3, target3, gamma=2.0))
    ref3 = _ref_focal_loss(logits3.astype(jnp.float32), target3, gamma=2.0)
    assert jnp.allclose(out3, ref3, rtol=5e-2, atol=5e-2), (out3, ref3)

    print("KERNEL_OK")
</pallas_src>

<mosaic_0001>
module attributes {stable_mosaic.version = 11 : i64} {
  func.func @_focal_loss_kernel(%arg0: i32, %arg1: memref<8x32xf32, #tpu.memory_space<vmem>>, %arg2: memref<8x1xi32, #tpu.memory_space<vmem>>, %arg3: memref<1x1x8xf32, #tpu.memory_space<vmem>>) attributes {dimension_semantics = [#tpu.dimension_semantics<parallel>], iteration_bounds = array<i64: 1>, scalar_prefetch = 0 : i64, scratch_operands = 0 : i64, tpu.core_type = #tpu.core_type<tc>, window_params = [{transform_indices = @transform_0, window_bounds = array<i64: 8, 32>}, {transform_indices = @transform_1, window_bounds = array<i64: 8, 1>}, {transform_indices = @transform_2, window_bounds = array<i64: 1, 1, 8>}]} {
    %c0 = arith.constant 0 : index
    %c0_0 = arith.constant 0 : index
    %0 = vector.load %arg1[%c0, %c0_0] : memref<8x32xf32, #tpu.memory_space<vmem>>, vector<8x32xf32>
    %c0_1 = arith.constant 0 : index
    %c0_2 = arith.constant 0 : index
    %1 = vector.load %arg2[%c0_1, %c0_2] : memref<8x1xi32, #tpu.memory_space<vmem>>, vector<8x1xi32>
    %cst = arith.constant dense<0xFF800000> : vector<8xf32>
    %2 = vector.multi_reduction <maximumf>, %0, %cst [1] : vector<8x32xf32> to vector<8xf32>
    %3 = vector.shape_cast %2 : vector<8xf32> to vector<8x1xf32>
    %4 = vector.broadcast %3 : vector<8x1xf32> to vector<8x32xf32>
    %5 = arith.subf %0, %4 : vector<8x32xf32>
    %6 = math.exp %5 : vector<8x32xf32>
    %cst_3 = arith.constant dense<0.000000e+00> : vector<8xf32>
    %7 = vector.multi_reduction <add>, %6, %cst_3 [1] : vector<8x32xf32> to vector<8xf32>
    %8 = vector.shape_cast %7 : vector<8xf32> to vector<8x1xf32>
    %9 = tpu.iota {dimensions = array<i32: 1>} : vector<8x32xi32>
    %10 = vector.broadcast %1 : vector<8x1xi32> to vector<8x32xi32>
    %11 = arith.cmpi eq, %9, %10 : vector<8x32xi32>
    %c0_i32 = arith.constant 0 : i32
    %12 = arith.sitofp %c0_i32 : i32 to f32
    %13 = vector.broadcast %12 : f32 to vector<8x32xf32>
    %14 = arith.select %11, %5, %13 : vector<8x32xi1>, vector<8x32xf32>
    %cst_4 = arith.constant dense<0.000000e+00> : vector<8xf32>
    %15 = vector.multi_reduction <add>, %14, %cst_4 [1] : vector<8x32xf32> to vector<8xf32>
    %16 = vector.shape_cast %15 : vector<8xf32> to vector<8x1xf32>
    %17 = math.log %8 : vector<8x1xf32>
    %18 = arith.subf %17, %16 : vector<8x1xf32>
    %cst_5 = arith.constant 0.000000e+00 : f32
    %19 = vector.broadcast %cst_5 : f32 to vector<8x1xf32>
    %20 = arith.maximumf %18, %19 : vector<8x1xf32>
    %cst_6 = arith.constant 0.000000e+00 : f32
    %21 = vector.broadcast %cst_6 : f32 to vector<8x1xf32>
    %22 = arith.subf %21, %20 : vector<8x1xf32>
    %23 = math.exp %22 : vector<8x1xf32>
    %cst_7 = arith.constant 1.000000e+00 : f32
    %24 = vector.broadcast %cst_7 : f32 to vector<8x1xf32>
    %25 = arith.subf %24, %23 : vector<8x1xf32>
    %26 = arith.mulf %25, %25 : vector<8x1xf32>
    %27 = arith.mulf %26, %20 : vector<8x1xf32>
    %28 = tpu.transpose %27, [1, 0] : vector<8x1xf32> -> vector<1x8xf32>
    %c8_i32 = arith.constant 8 : i32
    %29 = arith.muli %arg0, %c8_i32 : i32
    %30 = tpu.iota {dimensions = array<i32: 1>} : vector<1x8xi32>
    %31 = vector.broadcast %29 : i32 to vector<1x8xi32>
    %32 = arith.addi %31, %30 : vector<1x8xi32>
    %c8_i32_8 = arith.constant 8 : i32
    %33 = vector.broadcast %c8_i32_8 : i32 to vector<1x8xi32>
    %34 = arith.cmpi slt, %32, %33 : vector<1x8xi32>
    %cst_9 = arith.constant 0.000000e+00 : f32
    %35 = vector.broadcast %cst_9 : f32 to vector<1x8xf32>
    %36 = arith.select %34, %28, %35 : vector<1x8xi1>, vector<1x8xf32>
    %37 = vector.shape_cast %36 : vector<1x8xf32> to vector<1x1x8xf32>
    %c0_10 = arith.constant 0 : index
    %c0_11 = arith.constant 0 : index
    %c0_12 = arith.constant 0 : index
    %38 = vector.load %arg3[%c0_10, %c0_11, %c0_12] : memref<1x1x8xf32, #tpu.memory_space<vmem>>, vector<1x1x8xf32>
    tpu.vector_store %arg3[%c0_10, %c0_11, %c0_12], %37 {strides = array<i32>} : memref<1x1x8xf32, #tpu.memory_space<vmem>>, vector<1x1x8xf32>,
    return
  }
  func.func @transform_0(%arg0: i32) -> (i32, i32) {
    %c0_i32 = arith.constant 0 : i32
    %c0_i32_0 = arith.constant 0 : i32
    return %arg0, %c0_i32 : i32, i32
  }
  func.func @transform_1(%arg0: i32) -> (i32, i32) {
    %c0_i32 = arith.constant 0 : i32
    %c0_i32_0 = arith.constant 0 : i32
    return %arg0, %c0_i32 : i32, i32
  }
  func.func @transform_2(%arg0: i32) -> (i32, i32, i32) {
    %c0_i32 = arith.constant 0 : i32
    %c0_i32_0 = arith.constant 0 : i32
    %c0_i32_1 = arith.constant 0 : i32
    return %arg0, %c0_i32, %c0_i32_0 : i32, i32, i32
  }
}

</mosaic_0001>

<bundles_post_ra>
// kernel: tpu_custom_call.1
= control target key start
LH: loop header
LB: loop body
LE: loop exit
PB: predicated region body
PF: predicated region fallthrough
CT: control target
= control target key end

     0   :  { %vm14_vm0 = vcmask 261120   ;;  %s169_s0 = inlined_call_operand.vmem [shape: f32[8,32], index: 0, kind: input, shape index: {}]   ;;  %s170_s1 = inlined_call_operand.vmem [shape: s32[8,1], index: 1, kind: input, shape index: {}]   ;;  %s171_s2 = inlined_call_operand.hbm [shape: f32[1,1,8], index: 2, kind: output, shape index: {}]  }
   0x1   :  { %v12_v0 = vld [vmem:[%s169_s0] sm:$0xff] }
   0x2   :  { %7 = vsyncpa [#allocation3], 0  ;;  %v15_v1 = vsel %vm14_vm0, %v12_v0, -inf  ;;  %v131_v2 = vmov 0   ;;  %v13_v3 = vld [vmem:[%s170_s1] sm:$0xff]  ;;  %v24_v7 = vlaneseq  ;;  %s132_s0 = smov [#allocation2]  }
   0x3   :  { %100 = vset.pattern.permute.xlu0 %v131_v2  ;;  %s89_s1 = sshll.u32 %s132_s0, 4  ;;  %vm81_vm3 = vcmask 57344   ;;  %s90_s1 = int_to_ptr.vmem [resolvable:$true] %s89_s1 }
   0x4   :  { %16 = vmax.xlane.f32.xlu0 %v15_v1  ;;  %v25_v8 = vand.u32 127, %v24_v7  ;;  %s107_s13 = scalar_lea.vmem %s90_s1, 16  ;;  %s111_s14 = scalar_lea.vmem %s90_s1, 32 }
   0x5   :  { %p108_p0 = scmp.ne.s32.totalorder %s90_s1, %s107_s13  ;;  %p112_p1 = scmp.lt.s32.totalorder %s90_s1, %s90_s1 }
   0x6   :  { %vm79_vm2 = vcmp.lt.s32.totalorder %v25_v8, 8  ;;  %p113_p2 = scmp.lt.s32.totalorder %s111_s14, %s107_s13 }
   0x8   :  { %p114_p3 = por %p113_p2, %p112_p1 }
   0xa   :  { %p115_p4 = pnand %p114_p3, %p108_p0 }
  0x1a   :  { %27 = vperm.xlu0 %100, %v13_v3  }
  0x91   :  { %v17_v4 = vpop.xlane.xlu0 %16 }
  0x92   :  { %v18_v5 = vsub.f32 %v12_v0, %v17_v4 }
  0x94   :  { %v19_v6 = vmul.f32 1.442695, %v18_v5 }
  0x96   :  { %101 = vpow2.f32 %v19_v6 }
  0x99   :  { %v28_v9 = vpop.permute.xlu0 %27 }
  0x9a   :  { %vm29_vm1 = vcmp.eq.s32.totalorder %v25_v8, %v28_v9 }
  0x9b   :  { %v30_v12 = vsel %vm29_vm1, %v18_v5, 0.0 }
  0x9c   :  { %v31_v13 = vsel %vm14_vm0, %v30_v12, 0.0 }
  0xa0   :  { %v102_v10 = vpop.eup %101 }
  0xa1   :  { %v21_v11 = vsel %vm14_vm0, %v102_v10, 0.0 }
  0xa2   :  { %22 = vadd.xlane.f32.xlu1 %v21_v11 }
  0xa6   :  { %32 = vadd.xlane.f32.xlu1 %v31_v13 }
 0x12f   :  { %v23_v14 = vpop.xlane.xlu1 %22 }
 0x130   :  { %103 = vlog2.f32 %v23_v14 }
 0x133   :  { %v33_v17 = vpop.xlane.xlu1 %32 }
 0x13a   :  { %v104_v15 = vpop.eup %103 }
 0x13b   :  { %v35_v16 = vmul.f32 0.6931472, %v104_v15 }
 0x13d   :  { %v36_v18 = vsub.f32 %v35_v16, %v33_v17 }
 0x13f   :  { %v37_v19 = vmax.f32 %v36_v18, 0.0 }
 0x141   :  { %v38_v20 = vsub.f32 0.0, %v37_v19 }
 0x143   :  { %v39_v21 = vmul.f32 1.442695, %v38_v20 }
 0x145   :  { %105 = vpow2.f32 %v39_v21 }
 0x14f   :  { %v106_v22 = vpop.eup %105 }
 0x150   :  { %v41_v23 = vsub.f32 1.0, %v106_v22 }
 0x152   :  { %v42_v24 = vmul.f32 %v41_v23, %v41_v23 }
 0x154   :  { %v43_v25 = vmul.f32 %v42_v24, %v37_v19 }
 0x156   :  { %44 = vxpose.xlu1.b32.start.end [1/1] (short) (narrow) %v43_v25, 8 }
 0x1d6   :  { %v60_v26 = vpop.trf.xlu1 }
 0x1d7   :  { %v80_v27 = vsel %vm79_vm2, %v60_v26, 0.0 }
 0x1d8   :  { %82 = vst.msk [vmem:[#allocation2] sm:$0x1] %vm81_vm3, %v80_v27 }
 0x1d9   :  { %118 = shalt.err (!%p115_p4)
}
 0x1da   :  { %s119_s17 = scalar_lea.hbm %s171_s2, 16 }
 0x1db   :  { %p120_p5 = scmp.ne.s32.totalorder %s171_s2, %s119_s17  ;;  %p123_p6 = scmp.lt.u32.totalorder %s119_s17, %s171_s2 }
 0x1dd   :  { %p125_p7 = pnand %p123_p6, %p120_p5 }
 0x1df   :  { %128 = shalt.err (!%p125_p7)
}
 0x1e0   :  { %92 = dma.vmem_to_hbm [thread:$0]  %s90_s1, 16, %s171_s2, [#allocation3]  }
 0x1e1   :  { %129 = dma.done.wait [#allocation3], 16  }
 0x1e2   :  { %130 = vsyncadd [#allocation3], 4294967280 }
 0x1e3   :  { %96 = vsyncpa [#allocation3], 1 }

</bundles_post_ra>
